<compile_context>
chip_gen: v6e
topology: v6e:2x2x1
jax: 0.10.0
libtpu: 0.0.40
codegen_flags: <defaults>
</compile_context>

<pallas_src>
import functools

import jax
import jax.numpy as jnp
from jax.experimental import pallas as pl
from jax.experimental.pallas import tpu as pltpu

GAMMA = 1.5
ALPHA = 0.25
LANES = 128
SUBLANES = 8
# 2048 rows x 128 lanes x 4 B = 1 MiB per f32 input block; 2 inputs x 2
# pipeline buffers = 4 MiB VMEM.  Mem-bound sweet spot on v5e/v6e, portable
# to v7x's smaller VMEM without touching vmem_limit_bytes.
DEFAULT_BLOCK_ROWS = 2048


def _round_up(x, m):
    return ((x + m - 1) // m) * m


def _cdiv(a, b):
    return (a + b - 1) // b


def _focal_loss_kernel(pred_ref, true_ref, out_ref, *, gamma, alpha, steps,
                       block_rows, need_mask, full_rows, tail_lanes):
    c = pl.program_id(0)   # parallel (per-TensorCore) axis
    i = pl.program_id(1)   # sequential reduction axis

    # Output block index is independent of i -> it stays resident in VMEM and
    # doubles as the per-core (8,128) accumulator (no scratch needed).
    @pl.when(i == 0)
    def _():
        out_ref[...] = jnp.zeros_like(out_ref)

    # Native dtype straight from HBM; widen to f32 in-register.
    x = pred_ref[...].astype(jnp.float32)
    y = true_ref[...].astype(jnp.float32)

    # One shared exp(-|x|) feeds both the numerically stable BCE term and the
    # sigmoid.  EUP pushes per vreg: exp, log1p, approx-recip, sqrt.
    e = jnp.exp(-jnp.abs(x))
    # BCEWithLogitsLoss(reduction='none'): max(x,0) - x*y + log(1+exp(-|x|))
    bce = jnp.maximum(x, 0.0) - x * y + jnp.log1p(e)

    # sigmoid(x) = where(x>=0, 1, e) / (1+e).  Approx EUP reciprocal plus one
    # Newton step (2 VALU ops, free filler when mem-bound) keeps p at f32
    # accuracy instead of ~1e-3.
    denom = 1.0 + e
    inv = pl.reciprocal(denom, approx=True)
    inv = inv * (2.0 - denom * inv)
    p = jnp.where(x >= 0.0, 1.0, e) * inv

    # Algebraic fusion (constants folded at trace time):
    #   t            = 1 - p_t          = p + y*(1 - 2p)
    #   alpha_factor = y*a + (1-y)(1-a)  = (1-a) + y*(2a - 1)
    t = jnp.maximum(p + y * (1.0 - 2.0 * p), 0.0)
    alpha_factor = (1.0 - alpha) + y * (2.0 * alpha - 1.0)

    if gamma == 1.5:
        # t**1.5 without exp/log.
        # TODO(synk): if a v7x bundle dump shows the EUP slot binding, swap
        # jnp.sqrt for a VALU-only Newton/minimax approximation.
        modulating = t * jnp.sqrt(t)
    elif gamma == 2.0:
        modulating = t * t
    elif gamma == 1.0:
        modulating = t
    elif gamma == 0.0:
        modulating = jnp.ones_like(t)
    else:
        modulating = jnp.power(t, gamma)   # generic fallback

    loss = bce * alpha_factor * modulating

    def tile_sum(v):
        # Per-lane/sublane partial sums: pure VALU vreg adds, no per-step XLU
        # reduce.  The single cross-lane reduce runs in the XLA epilogue.
        return v.reshape(block_rows // SUBLANES, SUBLANES, LANES).sum(axis=0)

    if need_mask:
        row0 = (c * steps + i) * block_rows   # logical first row of this tile
        is_full = row0 + block_rows <= full_rows

        @pl.when(is_full)
        def _():
            out_ref[...] += tile_sum(loss)[None]

        @pl.when(jnp.logical_not(is_full))
        def _():
            # Only the partial / ghost tile(s) pay for the iotas + mask.
            ridx = jax.lax.broadcasted_iota(jnp.int32, loss.shape, 0)
            grow = row0 + ridx
            valid = grow < full_rows
            if tail_lanes:
                lidx = jax.lax.broadcasted_iota(jnp.int32, loss.shape, 1)
                valid = valid | ((grow == full_rows) & (lidx < tail_lanes))
            out_ref[...] += tile_sum(jnp.where(valid, loss, 0.0))[None]
    else:
        out_ref[...] += tile_sum(loss)[None]


def focal_loss(pred, true, *, gamma=GAMMA, alpha=ALPHA,
               block_rows=DEFAULT_BLOCK_ROWS):
    """Focal loss with mean reduction over arbitrarily shaped logits/targets."""
    assert pred.shape == true.shape
    n_elems = pred.size
    assert n_elems > 0

    flat_pred = pred.reshape(-1)
    flat_true = true.reshape(-1)

    rows_raw = _cdiv(n_elems, LANES)
    # Tile height: multiple of 16 rows (covers f32 and bf16 minimum tiles),
    # clamped so tiny inputs use a single small tile.
    tm = min(_round_up(block_rows, 16), _round_up(rows_raw, 16))

    # Only pad to a multiple of 128 lanes (<=127 elems), plus a tiny row pad
    # for inputs smaller than a single tile.  Everything else (partial last
    # block, ghost blocks) is masked in-kernel -- no whole-block host pad.
    rows = rows_raw if rows_raw >= tm else tm
    pad = rows * LANES - n_elems
    if pad:
        flat_pred = jnp.pad(flat_pred, (0, pad))
        flat_true = jnp.pad(flat_true, (0, pad))

    nb = _cdiv(rows, tm)              # real blocks (last one may be partial)

    # Split the block range across 2 cores when there is more than one block
    # (v7x dual-TC megacore); single-TC chips just run the axis serially.
    ncores = 2 if nb >= 2 else 1
    steps = _cdiv(nb, ncores)
    # "Ghost" blocks (odd nb) are clamped to the last real block in the
    # index_map and fully masked out inside the kernel.
    need_mask = (ncores * steps * tm * LANES) != n_elems

    pred2d = flat_pred.reshape(rows, LANES)   # free bitcast, native dtype
    true2d = flat_true.reshape(rows, LANES)

    kernel = functools.partial(
        _focal_loss_kernel,
        gamma=float(gamma),
        alpha=float(alpha),
        steps=steps,
        block_rows=tm,
        need_mask=bool(need_mask),
        full_rows=n_elems // LANES,
        tail_lanes=n_elems % LANES,
    )

    last_block = nb - 1
    row_map = lambda c, i: (jnp.minimum(c * steps + i, last_block), 0)

    partials = pl.pallas_call(
        kernel,
        out_shape=jax.ShapeDtypeStruct((ncores, SUBLANES, LANES), jnp.float32),
        grid_spec=pltpu.PrefetchScalarGridSpec(
            num_scalar_prefetch=0,
            grid=(ncores, steps),
            in_specs=[
                pl.BlockSpec((tm, LANES), row_map),
                pl.BlockSpec((tm, LANES), row_map),
            ],
            # Lane-dense per-core accumulator output (no sub-lane (1,1) block);
            # cross-lane reduce + divide happen in the XLA epilogue.
            out_specs=pl.BlockSpec((1, SUBLANES, LANES),
                                   lambda c, i: (c, 0, 0)),
        ),
        compiler_params=pltpu.CompilerParams(
            dimension_semantics=("parallel", "arbitrary")),
    )(pred2d, true2d)

    return jnp.sum(partials) / n_elems


def _focal_loss_ref(pred, true, gamma=GAMMA, alpha=ALPHA):
    x = pred.astype(jnp.float32)
    y = true.astype(jnp.float32)
    bce = jnp.maximum(x, 0.0) - x * y + jnp.log1p(jnp.exp(-jnp.abs(x)))
    p = jax.nn.sigmoid(x)
    p_t = y * p + (1.0 - y) * (1.0 - p)
    af = y * alpha + (1.0 - y) * (1.0 - alpha)
    mf = (1.0 - p_t) ** gamma
    return jnp.mean(bce * af * mf)


def _check(pred, true, rtol=5e-4, **kw):
    out = jax.block_until_ready(focal_loss(pred, true, **kw))
    ref = _focal_loss_ref(pred, true)
    assert jnp.allclose(out, ref, rtol=rtol, atol=1e-6), (out, ref)


if __name__ == "__main__":
    key = jax.random.PRNGKey(0)
    ks = jax.random.split(key, 10)

    # 1) NCHW logits, element count divisible by 8*128 (single full block,
    #    no masking path).
    pred = jax.random.normal(ks[0], (2, 4, 16, 16), dtype=jnp.float32) * 2.0
    true = jax.random.uniform(ks[1], (2, 4, 16, 16), dtype=jnp.float32)
    _check(pred, true)

    # 2) Ragged element count (2*3*13*13 = 1014): lane-tail + tiny row pad,
    #    mean divisor stays the true element count.
    pred_r = jax.random.normal(ks[2], (2, 3, 13, 13), dtype=jnp.float32) * 2.0
    true_r = jax.random.uniform(ks[3], (2, 3, 13, 13), dtype=jnp.float32)
    _check(pred_r, true_r)

    # 3) Multi-block dual-core grid path, evenly divisible (no mask).
    pred_m = jax.random.normal(ks[4], (2, 4, 64, 64), dtype=jnp.float32) * 2.0
    true_m = jax.random.uniform(ks[5], (2, 4, 64, 64), dtype=jnp.float32)
    _check(pred_m, true_m, block_rows=64)

    # 4) Partial last block + odd block count (ghost block on core 1), with
    #    no host padding at all: 2*3*40*40 = 9600 elems -> 75 rows, tm=32.
    pred_p = jax.random.normal(ks[6], (2, 3, 40, 40), dtype=jnp.float32) * 2.0
    true_p = jax.random.uniform(ks[7], (2, 3, 40, 40), dtype=jnp.float32)
    _check(pred_p, true_p, block_rows=32)

    # 5) bf16 activations streamed natively (widened to f32 in-register).
    pred_b = (jax.random.normal(ks[8], (2, 4, 16, 16)) * 2.0).astype(jnp.bfloat16)
    true_b = jax.random.uniform(ks[9], (2, 4, 16, 16)).astype(jnp.bfloat16)
    _check(pred_b, true_b, rtol=2e-3)

    print("KERNEL_OK")
</pallas_src>

<mosaic_0001>
module attributes {stable_mosaic.version = 11 : i64} {
  func.func @_focal_loss_kernel(%arg0: i32, %arg1: i32, %arg2: memref<16x128xf32, #tpu.memory_space<vmem>>, %arg3: memref<16x128xf32, #tpu.memory_space<vmem>>, %arg4: memref<1x8x128xf32, #tpu.memory_space<vmem>>) attributes {dimension_semantics = [#tpu.dimension_semantics<parallel>, #tpu.dimension_semantics<arbitrary>], iteration_bounds = array<i64: 1, 1>, scalar_prefetch = 0 : i64, scratch_operands = 0 : i64, tpu.core_type = #tpu.core_type<tc>, window_params = [{transform_indices = @transform_0, window_bounds = array<i64: 16, 128>}, {transform_indices = @transform_1, window_bounds = array<i64: 16, 128>}, {transform_indices = @transform_2, window_bounds = array<i64: 1, 8, 128>}]} {
    %c0_i32 = arith.constant 0 : i32
    %0 = arith.cmpi eq, %arg1, %c0_i32 : i32
    %1 = arith.extui %0 : i1 to i32
    %c0_i32_0 = arith.constant 0 : i32
    %2 = arith.cmpi ne, %1, %c0_i32_0 : i32
    scf.if %2 {
      %cst_21 = arith.constant 0.000000e+00 : f32
      %49 = vector.broadcast %cst_21 : f32 to vector<1x8x128xf32>
      %c0_22 = arith.constant 0 : index
      %c0_23 = arith.constant 0 : index
      %c0_24 = arith.constant 0 : index
      %50 = vector.load %arg4[%c0_22, %c0_23, %c0_24] : memref<1x8x128xf32, #tpu.memory_space<vmem>>, vector<1x8x128xf32>
      tpu.vector_store %arg4[%c0_22, %c0_23, %c0_24], %49 {strides = array<i32>} : memref<1x8x128xf32, #tpu.memory_space<vmem>>, vector<1x8x128xf32>,
    } else {
    }
    %c0 = arith.constant 0 : index
    %c0_1 = arith.constant 0 : index
    %3 = vector.load %arg2[%c0, %c0_1] : memref<16x128xf32, #tpu.memory_space<vmem>>, vector<16x128xf32>
    %c0_2 = arith.constant 0 : index
    %c0_3 = arith.constant 0 : index
    %4 = vector.load %arg3[%c0_2, %c0_3] : memref<16x128xf32, #tpu.memory_space<vmem>>, vector<16x128xf32>
    %5 = math.absf %3 : vector<16x128xf32>
    %cst = arith.constant 0.000000e+00 : f32
    %6 = vector.broadcast %cst : f32 to vector<16x128xf32>
    %7 = arith.subf %6, %5 : vector<16x128xf32>
    %8 = math.exp %7 : vector<16x128xf32>
    %cst_4 = arith.constant 0.000000e+00 : f32
    %9 = vector.broadcast %cst_4 : f32 to vector<16x128xf32>
    %10 = arith.maximumf %3, %9 : vector<16x128xf32>
    %11 = arith.mulf %3, %4 : vector<16x128xf32>
    %12 = arith.subf %10, %11 : vector<16x128xf32>
    %13 = math.log1p %8 : vector<16x128xf32>
    %14 = arith.addf %12, %13 : vector<16x128xf32>
    %cst_5 = arith.constant 1.000000e+00 : f32
    %15 = vector.broadcast %cst_5 : f32 to vector<16x128xf32>
    %16 = arith.addf %15, %8 : vector<16x128xf32>
    %17 = tpu.reciprocal %16 {approx = true} : vector<16x128xf32> -> vector<16x128xf32>
    %18 = arith.mulf %16, %17 : vector<16x128xf32>
    %cst_6 = arith.constant 2.000000e+00 : f32
    %19 = vector.broadcast %cst_6 : f32 to vector<16x128xf32>
    %20 = arith.subf %19, %18 : vector<16x128xf32>
    %21 = arith.mulf %17, %20 : vector<16x128xf32>
    %cst_7 = arith.constant 0.000000e+00 : f32
    %22 = vector.broadcast %cst_7 : f32 to vector<16x128xf32>
    %23 = arith.cmpf oge, %3, %22 : vector<16x128xf32>
    %cst_8 = arith.constant 1.000000e+00 : f32
    %24 = vector.broadcast %cst_8 : f32 to vector<16x128xf32>
    %25 = arith.select %23, %24, %8 : vector<16x128xi1>, vector<16x128xf32>
    %26 = arith.mulf %25, %21 : vector<16x128xf32>
    %cst_9 = arith.constant 2.000000e+00 : f32
    %27 = vector.broadcast %cst_9 : f32 to vector<16x128xf32>
    %28 = arith.mulf %27, %26 : vector<16x128xf32>
    %cst_10 = arith.constant 1.000000e+00 : f32
    %29 = vector.broadcast %cst_10 : f32 to vector<16x128xf32>
    %30 = arith.subf %29, %28 : vector<16x128xf32>
    %31 = arith.mulf %4, %30 : vector<16x128xf32>
    %32 = arith.addf %26, %31 : vector<16x128xf32>
    %cst_11 = arith.constant 0.000000e+00 : f32
    %33 = vector.broadcast %cst_11 : f32 to vector<16x128xf32>
    %34 = arith.maximumf %32, %33 : vector<16x128xf32>
    %cst_12 = arith.constant -5.000000e-01 : f32
    %35 = vector.broadcast %cst_12 : f32 to vector<16x128xf32>
    %36 = arith.mulf %4, %35 : vector<16x128xf32>
    %cst_13 = arith.constant 7.500000e-01 : f32
    %37 = vector.broadcast %cst_13 : f32 to vector<16x128xf32>
    %38 = arith.addf %37, %36 : vector<16x128xf32>
    %39 = math.sqrt %34 : vector<16x128xf32>
    %40 = arith.mulf %34, %39 : vector<16x128xf32>
    %41 = arith.mulf %14, %38 : vector<16x128xf32>
    %42 = arith.mulf %41, %40 : vector<16x128xf32>
    %c0_14 = arith.constant 0 : index
    %c0_15 = arith.constant 0 : index
    %c0_16 = arith.constant 0 : index
    %43 = vector.load %arg4[%c0_14, %c0_15, %c0_16] : memref<1x8x128xf32, #tpu.memory_space<vmem>>, vector<1x8x128xf32>
    %44 = vector.shape_cast %42 : vector<16x128xf32> to vector<2x8x128xf32>
    %cst_17 = arith.constant dense<0.000000e+00> : vector<8x128xf32>
    %45 = vector.multi_reduction <add>, %44, %cst_17 [0] : vector<2x8x128xf32> to vector<8x128xf32>
    %46 = vector.shape_cast %45 : vector<8x128xf32> to vector<1x8x128xf32>
    %47 = arith.addf %43, %46 : vector<1x8x128xf32>
    %c0_18 = arith.constant 0 : index
    %c0_19 = arith.constant 0 : index
    %c0_20 = arith.constant 0 : index
    %48 = vector.load %arg4[%c0_18, %c0_19, %c0_20] : memref<1x8x128xf32, #tpu.memory_space<vmem>>, vector<1x8x128xf32>
    tpu.vector_store %arg4[%c0_18, %c0_19, %c0_20], %47 {strides = array<i32>} : memref<1x8x128xf32, #tpu.memory_space<vmem>>, vector<1x8x128xf32>,
    return
  }
  func.func @transform_0(%arg0: i32, %arg1: i32) -> (i32, i32) {
    %c1_i32 = arith.constant 1 : i32
    %0 = arith.muli %arg0, %c1_i32 : i32
    %1 = arith.addi %0, %arg1 : i32
    %c0_i32 = arith.constant 0 : i32
    %2 = arith.minsi %1, %c0_i32 : i32
    %c0_i32_0 = arith.constant 0 : i32
    %c0_i32_1 = arith.constant 0 : i32
    return %2, %c0_i32_0 : i32, i32
  }
  func.func @transform_1(%arg0: i32, %arg1: i32) -> (i32, i32) {
    %c1_i32 = arith.constant 1 : i32
    %0 = arith.muli %arg0, %c1_i32 : i32
    %1 = arith.addi %0, %arg1 : i32
    %c0_i32 = arith.constant 0 : i32
    %2 = arith.minsi %1, %c0_i32 : i32
    %c0_i32_0 = arith.constant 0 : i32
    %c0_i32_1 = arith.constant 0 : i32
    return %2, %c0_i32_0 : i32, i32
  }
  func.func @transform_2(%arg0: i32, %arg1: i32) -> (i32, i32, i32) {
    %c0_i32 = arith.constant 0 : i32
    %c0_i32_0 = arith.constant 0 : i32
    %c0_i32_1 = arith.constant 0 : i32
    return %arg0, %c0_i32, %c0_i32_0 : i32, i32, i32
  }
}

</mosaic_0001>

<bundles_post_ra>
// kernel: tpu_custom_call.1
= control target key start
LH: loop header
LB: loop body
LE: loop exit
PB: predicated region body
PF: predicated region fallthrough
CT: control target
= control target key end

     0   :  { %7 = vsyncpa [#allocation3], 0  ;;  %s306_s0 = inlined_call_operand.hbm [shape: f32[16,128], index: 0, kind: input, shape index: {}]   ;;  %s307_s1 = inlined_call_operand.hbm [shape: f32[16,128], index: 1, kind: input, shape index: {}]   ;;  %s308_s2 = inlined_call_operand.hbm [shape: f32[1,8,128], index: 2, kind: output, shape index: {}]  }
   0x1   :  { %8 = vsyncpa [#allocation6], 0 }
   0x2   :  { %9 = vsyncpa [#allocation4], 0  ;;  %s265_s9 = smov [#allocation2]  }
   0x3   :  { %s21_s10 = sshll.u32 %s265_s9, 4  ;;  %s22_s10 = int_to_ptr.vmem [resolvable:$true] %s21_s10 }
   0x4   :  { %s207_s11 = scalar_lea.vmem %s22_s10, 256  ;;  %p212_p1 = scmp.lt.s32.totalorder %s22_s10, %s22_s10 }
   0x5   :  { %p208_p0 = scmp.ne.s32.totalorder %s22_s10, %s207_s11  ;;  %p213_p2 = scmp.lt.s32.totalorder %s207_s11, %s207_s11 }
   0x7   :  { %p214_p3 = por %p213_p2, %p212_p1 }
   0x9   :  { %p215_p4 = pnand %p214_p3, %p208_p0 }
   0xb   :  { %218 = shalt.err (!%p215_p4)
}
   0xc   :  { %s266_s12 = smov 128   ;;  %s267_s13 = smov 8  }
   0xd   :  { %27 = dma.hbm_to_vmem [thread:$0]  %s306_s0, 256, %s22_s10, [#allocation3], %s266_s12, %s266_s12, %s267_s13  }
   0xe   :  { %s268_s16 = smov [#allocation5]  }
   0xf   :  { %s39_s17 = sshll.u32 %s268_s16, 4  ;;  %s40_s17 = int_to_ptr.vmem [resolvable:$true] %s39_s17 }
  0x10   :  { %s227_s18 = scalar_lea.vmem %s40_s17, 256  ;;  %p232_p6 = scmp.lt.s32.totalorder %s40_s17, %s40_s17 }
  0x11   :  { %p228_p5 = scmp.ne.s32.totalorder %s40_s17, %s227_s18  ;;  %p233_p7 = scmp.lt.s32.totalorder %s227_s18, %s227_s18 }
  0x13   :  { %p234_p8 = por %p233_p7, %p232_p6 }
  0x15   :  { %p235_p9 = pnand %p234_p8, %p228_p5 }
  0x17   :  { %238 = shalt.err (!%p235_p9)
}
  0x18   :  { %45 = dma.hbm_to_vmem [thread:$0]  %s307_s1, 256, %s40_s17, [#allocation6], %s266_s12, %s266_s12, %s267_s13  }
  0x19   :  { %259 = dma.done.wait [#allocation3], 256  }
  0x1a   :  { %260 = vsyncadd [#allocation3], 4294967040 }
  0x1b   :  { %261 = dma.done.wait [#allocation6], 256  }
  0x1c   :  { %262 = vsyncadd [#allocation6], 4294967040  ;;  %v291_v0 = vld [vmem:[#allocation2] sm:$0xff]  ;;  %v293_v1 = vld [vmem:[#allocation2 + $0x8] sm:$0xff]  ;;  %s269_s0 = smov [#allocation7]  }
  0x1d   :  { %v69_v2 = vand.u32 2147483647, %v291_v0  ;;  %v70_v3 = vand.u32 2147483647, %v293_v1  ;;  %vm113_vm0 = vcmp.ge.f32.partialorder %v291_v0, 0.0  ;;  %vm114_vm1 = vcmp.ge.f32.partialorder %v293_v1, 0.0 }
  0x1e   :  { %v67_v25 = vld [vmem:[#allocation5] sm:$0xff]  ;;  %v68_v27 = vld [vmem:[#allocation5 + $0x8] sm:$0xff]  ;;  %v77_v44 = vmax.f32 %v291_v0, 0.0  ;;  %v78_v46 = vmax.f32 %v293_v1, 0.0  ;;  %s163_s1 = sshll.u32 %s269_s0, 4  ;;  %s164_s1 = int_to_ptr.vmem [resolvable:$true] %s163_s1 }
  0x1f   :  { %v71_v4 = vsub.f32 0.0, %v69_v2  ;;  %v72_v5 = vsub.f32 0.0, %v70_v3  ;;  %v79_v45 = vmul.f32 %v67_v25, %v291_v0  ;;  %v80_v47 = vmul.f32 %v68_v27, %v293_v1  ;;  %s239_s21 = scalar_lea.vmem %s164_s1, 128  ;;  %p244_p11 = scmp.lt.s32.totalorder %s164_s1, %s164_s1 }
  0x20   :  { %v129_v53 = vmul.f32 -0.5, %v67_v25  ;;  %v130_v56 = vmul.f32 -0.5, %v68_v27  ;;  %p240_p10 = scmp.ne.s32.totalorder %s164_s1, %s239_s21  ;;  %p245_p12 = scmp.lt.s32.totalorder %s239_s21, %s239_s21 }
  0x21   :  { %v73_v6 = vmul.f32 1.442695, %v71_v4  ;;  %v75_v7 = vmul.f32 1.442695, %v72_v5  ;;  %v81_v52 = vsub.f32 %v77_v44, %v79_v45  ;;  %v82_v54 = vsub.f32 %v78_v46, %v80_v47 }
  0x22   :  { %v131_v59 = vadd.f32 0.75, %v129_v53  ;;  %v132_v62 = vadd.f32 0.75, %v130_v56  ;;  %p246_p13 = por %p245_p12, %p244_p11 }
  0x23   :  { %183 = vpow2.f32 %v73_v6 }
  0x24   :  { %185 = vpow2.f32 %v75_v7  ;;  %p247_p0 = pnand %p246_p13, %p240_p10 }
  0x30   :  { %v184_v8 = vpop.eup %183 }
  0x31   :  { %v186_v9 = vpop.eup %185  ;;  %v83_v10 = vadd.f32 1.0, %v184_v8  ;;  %v115_v18 = vsel %vm113_vm0, 1.0, %v184_v8  ;;  %v86_v33 = vmul.f32 -0.5, %v184_v8  ;;  %v89_v40 = vand.u32 2147483647, %v184_v8 }
  0x32   :  { %v92_v11 = vadd.f32 1.0, %v186_v9  ;;  %v116_v20 = vsel %vm114_vm1, 1.0, %v186_v9  ;;  %v95_v35 = vmul.f32 -0.5, %v186_v9  ;;  %v98_v43 = vand.u32 2147483647, %v186_v9 }
  0x33   :  { %187 = vrcp.f32 %v83_v10  ;;  %v87_v38 = vadd.f32 1.0, %v86_v33  ;;  %vm90_vm2 = vcmp.lt.f32.partialorder %v89_v40, 0.0004427343 }
  0x34   :  { %189 = vrcp.f32 %v92_v11  ;;  %v96_v41 = vadd.f32 1.0, %v95_v35  ;;  %vm99_vm3 = vcmp.lt.f32.partialorder %v98_v43, 0.0004427343 }
  0x35   :  { %191 = vlog2.f32 %v83_v10  ;;  %v88_v49 = vmul.f32 %v184_v8, %v87_v38 }
  0x36   :  { %193 = vlog2.f32 %v92_v11  ;;  %v97_v51 = vmul.f32 %v186_v9, %v96_v41 }
  0x40   :  { %v188_v12 = vpop.eup %187 }
  0x41   :  { %v190_v13 = vpop.eup %189  ;;  %v107_v14 = vmul.f32 %v188_v12, %v83_v10 }
  0x42   :  { %v108_v15 = vmul.f32 %v190_v13, %v92_v11  ;;  %v192_v39 = vpop.eup %191 }
  0x43   :  { %v109_v16 = vsub.f32 2.0, %v107_v14  ;;  %v194_v42 = vpop.eup %193  ;;  %v85_v48 = vmul.f32 0.6931472, %v192_v39 }
  0x44   :  { %v110_v17 = vsub.f32 2.0, %v108_v15  ;;  %v94_v50 = vmul.f32 0.6931472, %v194_v42 }
  0x45   :  { %v111_v19 = vmul.f32 %v188_v12, %v109_v16  ;;  %v91_v55 = vsel %vm90_vm2, %v88_v49, %v85_v48 }
  0x46   :  { %v112_v21 = vmul.f32 %v190_v13, %v110_v17  ;;  %v100_v57 = vsel %vm99_vm3, %v97_v51, %v94_v50  ;;  %v101_v58 = vadd.f32 %v91_v55, %v81_v52 }
  0x47   :  { %v117_v22 = vmul.f32 %v115_v18, %v111_v19  ;;  %v102_v61 = vadd.f32 %v100_v57, %v82_v54 }
  0x48   :  { %v118_v23 = vmul.f32 %v116_v20, %v112_v21  ;;  %v149_v5 = vmul.f32 %v131_v59, %v101_v58 }
  0x49   :  { %v119_v24 = vmul.f32 2.0, %v117_v22  ;;  %v150_v8 = vmul.f32 %v132_v62, %v102_v61 }
  0x4a   :  { %v120_v26 = vmul.f32 2.0, %v118_v23 }
  0x4b   :  { %v121_v28 = vsub.f32 1.0, %v119_v24 }
  0x4c   :  { %v122_v29 = vsub.f32 1.0, %v120_v26 }
  0x4d   :  { %v123_v30 = vmul.f32 %v121_v28, %v67_v25 }
  0x4e   :  { %v124_v31 = vmul.f32 %v122_v29, %v68_v27 }
  0x4f   :  { %v125_v32 = vadd.f32 %v123_v30, %v117_v22 }
  0x50   :  { %v126_v34 = vadd.f32 %v124_v31, %v118_v23 }
  0x51   :  { %v127_v36 = vmax.f32 %v125_v32, 0.0 }
  0x52   :  { %v128_v37 = vmax.f32 %v126_v34, 0.0 }
  0x53   :  { %195 = vrsqrt.f32 %v127_v36  ;;  %vm135_vm4 = vcmp.eq.f32.partialorder %v127_v36, inf  ;;  %v138_v63 = vand.u32 2147483648, %v127_v36  ;;  %vm137_vm5 = vcmp.eq.f32.partialorder %v127_v36, 0.0 }
  0x54   :  { %197 = vrsqrt.f32 %v128_v37  ;;  %vm142_vm6 = vcmp.eq.f32.partialorder %v128_v37, inf  ;;  %v145_v2 = vand.u32 2147483648, %v128_v37  ;;  %vm144_vm7 = vcmp.eq.f32.partialorder %v128_v37, 0.0 }
  0x60   :  { %v196_v60 = vpop.eup %195 }
  0x61   :  { %v198_v0 = vpop.eup %197  ;;  %v134_v1 = vmul.f32 %v196_v60, %v127_v36 }
  0x62   :  { %v141_v3 = vmul.f32 %v198_v0, %v128_v37 }
  0x63   :  { %v136_v4 = vsel %vm135_vm4, %v127_v36, %v134_v1 }
  0x64   :  { %v139_v6 = vsel %vm137_vm5, %v138_v63, %v136_v4  ;;  %v143_v7 = vsel %vm142_vm6, %v128_v37, %v141_v3 }
  0x65   :  { %v146_v9 = vsel %vm144_vm7, %v145_v2, %v143_v7  ;;  %v147_v10 = vmul.f32 %v139_v6, %v127_v36 }
  0x66   :  { %v148_v11 = vmul.f32 %v146_v9, %v128_v37 }
  0x67   :  { %v151_v12 = vmul.f32 %v149_v5, %v147_v10 }
  0x68   :  { %v152_v13 = vmul.f32 %v150_v8, %v148_v11 }
  0x6a   :  { %v154_v14 = vadd.f32 %v152_v13, %v151_v12 }
  0x6c   :  { %156 = vst [vmem:[#allocation7] sm:$0xff] %v154_v14 }
  0x6d   :  { %250 = shalt.err (!%p247_p0)
}
  0x6e   :  { %166 = dma.vmem_to_hbm [thread:$0]  %s164_s1, 128, %s308_s2, [#allocation4]  }
  0x6f   :  { %263 = dma.done.wait [#allocation4], 128  }
  0x70   :  { %264 = vsyncadd [#allocation4], 4294967168 }
  0x71   :  { %170 = vsyncpa [#allocation3], 1 }
  0x72   :  { %171 = vsyncpa [#allocation6], 1 }
  0x73   :  { %172 = vsyncpa [#allocation4], 1 }

</bundles_post_ra>
